<compile_context>
chip_gen: v7x
topology: tpu7x:2x2x1
jax: 0.10.0
libtpu: 0.0.40
codegen_flags: <defaults>
</compile_context>

<pallas_src>
import functools

import jax
import jax.numpy as jnp
from jax.experimental import pallas as pl
from jax.experimental.pallas import tpu as pltpu


def _round_up(x, m):
    return (x + m - 1) // m * m


# ---------------------------------------------------------------------------
# Kernel 1: constituent projection (hoisted fc + lane-replicated edge logits)
#   z_ref <- h @ w_fc                          [tk, H*D]  bf16 (MXU operand out)
#   e_ref <- leaky_relu(z @ arep)              [tk, H*D]  bf16, per-head logit
#            replicated across the D lanes of its head (lane-dense output).
# Both dots use bf16 operands + f32 accumulation (MXU-native on v5e/v6e/v7x).
# ---------------------------------------------------------------------------
def _project_kernel(h_ref, wfc_ref, arep_ref, z_ref, e_ref, *, neg_slope):
    z = jnp.dot(h_ref[...], wfc_ref[...], preferred_element_type=jnp.float32)
    zb = z.astype(z_ref.dtype)                      # bf16: stored + logit operand
    e = jnp.dot(zb, arep_ref[...], preferred_element_type=jnp.float32)
    e = jnp.where(e >= 0.0, e, neg_slope * e)       # leaky_relu
    z_ref[...] = zb
    e_ref[...] = e.astype(e_ref.dtype)              # bf16 keeps f32 exponent range


# ---------------------------------------------------------------------------
# Kernel 1b: exp-hoist. Once per constituent (NOT per (Nt,Nc) tile):
#   exp_rep = exp(e - m)          [tk, H*D]   (m = global per-head max)
#   fused   = [ z * exp_rep | exp_rep ]   bf16   [tk, 2*H*D]
# Kernel 2 then needs no EUP/VPU work in its inner loop.
# ---------------------------------------------------------------------------
def _fuse_kernel(z_ref, e_ref, m_ref, fused_ref):
    hd = z_ref.shape[-1]
    exp_rep = jnp.exp(e_ref[...].astype(jnp.float32) - m_ref[...])   # [tk, H*D]
    w = (z_ref[...].astype(jnp.float32) * exp_rep).astype(fused_ref.dtype)
    fused_ref[:, :hd] = w
    fused_ref[:, hd:] = exp_rep.astype(fused_ref.dtype)


# ---------------------------------------------------------------------------
# Kernel 2: masked softmax + aggregation as ONE MXU matmul per (Nt, Nc) tile
#   acc += adj @ fused            [tm, 2*H*D]  (bf16 MXU, f32 accumulate)
#   out  = acc[:, :HD] / acc[:, HD:]   at finalize (EUP approx reciprocal)
# Subtracting a global per-head max (instead of a per-token max) cancels in the
# ratio, so no flash-style running max is needed across Nc tiles.
# ---------------------------------------------------------------------------
def _aggregate_kernel(adj_ref, fused_ref, out_ref, acc_ref):
    k = pl.program_id(1)

    @pl.when(k == 0)
    def _():
        acc_ref[...] = jnp.zeros_like(acc_ref)

    acc_ref[...] += jnp.dot(adj_ref[...], fused_ref[...],
                            preferred_element_type=jnp.float32)

    @pl.when(k == pl.num_programs(1) - 1)
    def _():
        hd = out_ref.shape[-1]
        num = acc_ref[:, :hd]
        den = jnp.maximum(acc_ref[:, hd:], 1e-30)   # guard isolated tokens (no NaN)
        out_ref[...] = (num * pl.reciprocal(den, approx=True)).astype(out_ref.dtype)


def ctgat_forward(h_cons, w_fc, a_src, adj, num_heads, out_dim, tm=512, tk=1024):
    """h_cons:[Nc,in_dim], w_fc:[in_dim,H*D], a_src:[D], adj:[Nt,Nc] -> [Nt,H,D]."""
    Nc, in_dim = h_cons.shape
    Nt = adj.shape[0]
    HD = num_heads * out_dim
    assert HD % 128 == 0, "H*D must be a multiple of 128 for lane-dense tiles"
    bf16 = jnp.bfloat16
    f32 = jnp.float32

    # ---- tile sizes (capped by the padded problem size) ---------------------
    # v7x note: keep n_i >= 2 for real workloads so both TensorCores get work.
    tk = min(tk, _round_up(Nc, 128))      # Nc tile: lane dim of adj block
    tm = min(tm, _round_up(Nt, 8))        # Nt tile: sublane dim of adj/out block
    Nc_p = _round_up(Nc, tk)
    Nt_p = _round_up(Nt, tm)
    n_k = Nc_p // tk
    n_i = Nt_p // tm

    # ---- padded / dtype-prepped operands (cast to bf16 BEFORE padding) ------
    h_p = jnp.pad(h_cons.astype(bf16), ((0, Nc_p - Nc), (0, 0)))
    adj_p = jnp.pad(adj.astype(bf16), ((0, Nt_p - Nt), (0, Nc_p - Nc)))  # 0/1 exact
    wfc_b = w_fc.astype(bf16)

    # a_src replicated into a block-diagonal [H*D, H*D] matrix so z @ arep gives
    # each head's logit already broadcast across its D lanes (no in-kernel repeat).
    # (For H*D > 256, a compact [H*D, 128] per-head-column form is cheaper.)
    blk = jnp.broadcast_to(a_src.astype(f32)[:, None], (out_dim, out_dim))
    arep = jnp.kron(jnp.eye(num_heads, dtype=f32), blk).astype(bf16)    # [HD, HD]

    # ---- kernel 1: projection (once per Nc tile, hoisted out of Nt loop) ----
    z_p, e_p = pl.pallas_call(
        functools.partial(_project_kernel, neg_slope=0.01),
        grid=(n_k,),
        in_specs=[
            pl.BlockSpec((tk, in_dim), lambda i: (i, 0)),
            pl.BlockSpec((in_dim, HD), lambda i: (0, 0)),
            pl.BlockSpec((HD, HD), lambda i: (0, 0)),
        ],
        out_specs=[
            pl.BlockSpec((tk, HD), lambda i: (i, 0)),
            pl.BlockSpec((tk, HD), lambda i: (i, 0)),
        ],
        out_shape=[
            jax.ShapeDtypeStruct((Nc_p, HD), bf16),   # z (MXU operand)
            jax.ShapeDtypeStruct((Nc_p, HD), bf16),   # e (lane-replicated logits)
        ],
        compiler_params=pltpu.CompilerParams(dimension_semantics=("parallel",)),
    )(h_p, wfc_b, arep)

    # Global per-head max over the small bf16 logit array (padded rows are 0,
    # which is a safe over-estimate: any m >= true max cancels in num/den).
    m = jnp.max(e_p.astype(f32), axis=0, keepdims=True)                # [1, H*D]

    # ---- kernel 1b: exp-hoist, build the fused bf16 RHS [ z*exp | exp ] -----
    fused = pl.pallas_call(
        _fuse_kernel,
        grid=(n_k,),
        in_specs=[
            pl.BlockSpec((tk, HD), lambda i: (i, 0)),
            pl.BlockSpec((tk, HD), lambda i: (i, 0)),
            pl.BlockSpec((1, HD), lambda i: (0, 0)),
        ],
        out_specs=pl.BlockSpec((tk, 2 * HD), lambda i: (i, 0)),
        out_shape=jax.ShapeDtypeStruct((Nc_p, 2 * HD), bf16),
        compiler_params=pltpu.CompilerParams(dimension_semantics=("parallel",)),
    )(z_p, e_p, m)

    # ---- kernel 2: tiled aggregation = one bf16 matmul per tile --------------
    out = pl.pallas_call(
        _aggregate_kernel,
        grid=(n_i, n_k),
        in_specs=[
            pl.BlockSpec((tm, tk), lambda i, k: (i, k)),               # adj tile
            pl.BlockSpec((tk, 2 * HD), lambda i, k: (k, 0)),           # fused tile
        ],
        out_specs=pl.BlockSpec((tm, HD), lambda i, k: (i, 0)),
        out_shape=jax.ShapeDtypeStruct((Nt_p, HD), jnp.float32),
        scratch_shapes=[pltpu.VMEM((tm, 2 * HD), jnp.float32)],        # num|den acc
        compiler_params=pltpu.CompilerParams(
            dimension_semantics=("parallel", "arbitrary")),
    )(adj_p, fused)

    return out[:Nt].reshape(Nt, num_heads, out_dim)


def ctgat_reference(h_cons, w_fc, a_src, adj, num_heads, out_dim):
    """Pure-JAX (f32 HIGHEST) reference of the same dense-graph formulation."""
    Nc = h_cons.shape[0]
    z = jnp.dot(h_cons, w_fc, precision=jax.lax.Precision.HIGHEST)
    z = z.reshape(Nc, num_heads, out_dim)
    e = jnp.einsum('chd,d->ch', z, a_src, precision=jax.lax.Precision.HIGHEST)
    e = jnp.where(e >= 0.0, e, 0.01 * e)
    mask = adj[:, :, None] > 0                             # [Nt, Nc, 1]
    logits = jnp.where(mask, e[None, :, :], -jnp.inf)      # [Nt, Nc, H]
    alpha = jax.nn.softmax(logits, axis=1)
    return jnp.einsum('tch,chd->thd', alpha, z, precision=jax.lax.Precision.HIGHEST)


if __name__ == "__main__":
    # Small, deterministic problem instance.
    in_dim = 32
    out_dim = 32
    num_heads = 4
    Nc = 16   # constituent nodes (carry 'z')
    Nt = 8    # token nodes (aggregate over constituent -> token edges)

    key = jax.random.PRNGKey(0)
    k_h, k_fc, k_attn, k_adj = jax.random.split(key, 4)

    # xavier_normal_ with gain = calculate_gain('relu') = sqrt(2)
    gain = jnp.sqrt(2.0)
    std_fc = gain * jnp.sqrt(2.0 / (in_dim + num_heads * out_dim))
    w_fc = std_fc * jax.random.normal(k_fc, (in_dim, num_heads * out_dim), jnp.float32)

    std_attn = gain * jnp.sqrt(2.0 / (1 + 2 * out_dim))
    a_full = std_attn * jax.random.normal(k_attn, (2 * out_dim,), jnp.float32)
    a_src = a_full[:out_dim]
    a_dst = a_full[out_dim:]  # TODO(synk): a_dst is a no-op here (token 'z' is zero-filled by DGL); kept for parity with attn_fc shape.

    h_cons = jax.random.normal(k_h, (Nc, in_dim), jnp.float32)

    # Random bipartite constituent->token adjacency; guarantee every token has >=1 neighbor.
    adj = (jax.random.uniform(k_adj, (Nt, Nc)) < 0.5).astype(jnp.float32)
    adj = adj.at[jnp.arange(Nt), jnp.arange(Nt)].set(1.0)

    out = ctgat_forward(h_cons, w_fc, a_src, adj, num_heads, out_dim)
    out = jax.block_until_ready(out)

    ref = ctgat_reference(h_cons, w_fc, a_src, adj, num_heads, out_dim)
    assert out.shape == (Nt, num_heads, out_dim)
    # Tolerance accounts for bf16 MXU operands throughout (per perf review).
    assert jnp.allclose(out, ref, atol=3e-2, rtol=3e-2), "kernel/reference mismatch"

    print("KERNEL_OK")
</pallas_src>

<mosaic_0001>
module attributes {stable_mosaic.version = 11 : i64} {
  func.func @_project_kernel(%arg0: i32, %arg1: memref<128x32xbf16, #tpu.memory_space<vmem>>, %arg2: memref<32x128xbf16, #tpu.memory_space<vmem>>, %arg3: memref<128x128xbf16, #tpu.memory_space<vmem>>, %arg4: memref<128x128xbf16, #tpu.memory_space<vmem>>, %arg5: memref<128x128xbf16, #tpu.memory_space<vmem>>) attributes {dimension_semantics = [#tpu.dimension_semantics<parallel>], iteration_bounds = array<i64: 1>, scalar_prefetch = 0 : i64, scratch_operands = 0 : i64, tpu.core_type = #tpu.core_type<tc>, window_params = [{transform_indices = @transform_0, window_bounds = array<i64: 128, 32>}, {pipeline_mode = #tpu.pipeline_mode<synchronous>, transform_indices = @transform_1, window_bounds = array<i64: 32, 128>}, {pipeline_mode = #tpu.pipeline_mode<synchronous>, transform_indices = @transform_2, window_bounds = array<i64: 128, 128>}, {transform_indices = @transform_3, window_bounds = array<i64: 128, 128>}, {transform_indices = @transform_4, window_bounds = array<i64: 128, 128>}]} {
    %c0 = arith.constant 0 : index
    %c0_0 = arith.constant 0 : index
    %0 = vector.load %arg1[%c0, %c0_0] : memref<128x32xbf16, #tpu.memory_space<vmem>>, vector<128x32xbf16>
    %c0_1 = arith.constant 0 : index
    %c0_2 = arith.constant 0 : index
    %1 = vector.load %arg2[%c0_1, %c0_2] : memref<32x128xbf16, #tpu.memory_space<vmem>>, vector<32x128xbf16>
    %cst = arith.constant dense<0.000000e+00> : vector<128x128xf32>
    %2 = tpu.matmul %0, %1, %cst {dimension_numbers = #tpu.dot_dimension_numbers<[1], [0], [0], [1], [0, 0, 1, 1], [], []>} : vector<128x32xbf16>, vector<32x128xbf16>, vector<128x128xf32> -> vector<128x128xf32>
    %3 = arith.truncf %2 : vector<128x128xf32> to vector<128x128xbf16>
    %c0_3 = arith.constant 0 : index
    %c0_4 = arith.constant 0 : index
    %4 = vector.load %arg3[%c0_3, %c0_4] : memref<128x128xbf16, #tpu.memory_space<vmem>>, vector<128x128xbf16>
    %cst_5 = arith.constant dense<0.000000e+00> : vector<128x128xf32>
    %5 = tpu.matmul %3, %4, %cst_5 {dimension_numbers = #tpu.dot_dimension_numbers<[1], [0], [0], [1], [0, 0, 1, 1], [], []>} : vector<128x128xbf16>, vector<128x128xbf16>, vector<128x128xf32> -> vector<128x128xf32>
    %cst_6 = arith.constant 0.000000e+00 : f32
    %6 = vector.broadcast %cst_6 : f32 to vector<128x128xf32>
    %7 = arith.cmpf oge, %5, %6 : vector<128x128xf32>
    %cst_7 = arith.constant 0.00999999977 : f32
    %8 = vector.broadcast %cst_7 : f32 to vector<128x128xf32>
    %9 = arith.mulf %8, %5 : vector<128x128xf32>
    %10 = arith.select %7, %5, %9 : vector<128x128xi1>, vector<128x128xf32>
    %c0_8 = arith.constant 0 : index
    %c0_9 = arith.constant 0 : index
    %11 = vector.load %arg4[%c0_8, %c0_9] : memref<128x128xbf16, #tpu.memory_space<vmem>>, vector<128x128xbf16>
    tpu.vector_store %arg4[%c0_8, %c0_9], %3 {strides = array<i32>} : memref<128x128xbf16, #tpu.memory_space<vmem>>, vector<128x128xbf16>,
    %12 = arith.truncf %10 : vector<128x128xf32> to vector<128x128xbf16>
    %c0_10 = arith.constant 0 : index
    %c0_11 = arith.constant 0 : index
    %13 = vector.load %arg5[%c0_10, %c0_11] : memref<128x128xbf16, #tpu.memory_space<vmem>>, vector<128x128xbf16>
    tpu.vector_store %arg5[%c0_10, %c0_11], %12 {strides = array<i32>} : memref<128x128xbf16, #tpu.memory_space<vmem>>, vector<128x128xbf16>,
    return
  }
  func.func @transform_0(%arg0: i32) -> (i32, i32) {
    %c0_i32 = arith.constant 0 : i32
    %c0_i32_0 = arith.constant 0 : i32
    return %arg0, %c0_i32 : i32, i32
  }
  func.func @transform_1(%arg0: i32) -> (i32, i32) {
    %c0_i32 = arith.constant 0 : i32
    %c0_i32_0 = arith.constant 0 : i32
    %c0_i32_1 = arith.constant 0 : i32
    return %c0_i32, %c0_i32_0 : i32, i32
  }
  func.func @transform_2(%arg0: i32) -> (i32, i32) {
    %c0_i32 = arith.constant 0 : i32
    %c0_i32_0 = arith.constant 0 : i32
    %c0_i32_1 = arith.constant 0 : i32
    return %c0_i32, %c0_i32_0 : i32, i32
  }
  func.func @transform_3(%arg0: i32) -> (i32, i32) {
    %c0_i32 = arith.constant 0 : i32
    %c0_i32_0 = arith.constant 0 : i32
    return %arg0, %c0_i32 : i32, i32
  }
  func.func @transform_4(%arg0: i32) -> (i32, i32) {
    %c0_i32 = arith.constant 0 : i32
    %c0_i32_0 = arith.constant 0 : i32
    return %arg0, %c0_i32 : i32, i32
  }
}

</mosaic_0001>

<bundles_post_ra>
// kernel: tpu_custom_call.1
= control target key start
LH: loop header
LB: loop body
LE: loop exit
PB: predicated region body
PF: predicated region fallthrough
CT: control target
= control target key end

     0   :  { %10 = vsyncpa [#allocation3], 0  ;;  %vm91_vm0 = vcmask 261120   ;;  %s1083_s0 = inlined_call_operand.vmem [shape: bf16[128,32], index: 0, kind: input, shape index: {}]   ;;  %s1084_s1 = inlined_call_operand.vmem [shape: bf16[32,128], index: 1, kind: input, shape index: {}]   ;;  %s1085_s2 = inlined_call_operand.vmem [shape: bf16[128,128], index: 2, kind: input, shape index: {}]   ;;  %s1086_s3 = inlined_call_operand.hbm [shape: bf16[128,128], index: 3, kind: output, shape index: {0}]   ;;  %s1087_s4 = inlined_call_operand.hbm [shape: bf16[128,128], index: 4, kind: output, shape index: {1}]  }
   0x1   :  { %v896_v0 = vld [vmem:[%s1084_s1] sm:$0xff]   ;;  %v897_v1 = vld [vmem:[%s1084_s1 + $0x8] sm:$0xff]   ;;  %v900_v4 = vld [vmem:[%s1083_s0 + $0x10] sm:$0xff]  }
   0x2   :  { %824 = vmatprep.subr.bf16.mxu0 %v896_v0  ;;  %v898_v2 = vld [vmem:[%s1083_s0] sm:$0xff]   ;;  %v899_v3 = vld [vmem:[%s1083_s0 + $0x8] sm:$0xff]   ;;  %v901_v7 = vld [vmem:[%s1083_s0 + $0x18] sm:$0xff]  }
   0x3   :  { %825 = vmatpush3.bf16.msra.mxu0 %v896_v0  ;;  %828 = vmatprep.mubr.msk.bf16.mxu0 %vm91_vm0, %v898_v2  ;;  %v906_v5 = vld [vmem:[%s1085_s2] sm:$0xff]   ;;  %v907_v6 = vld [vmem:[%s1085_s2 + $0x8] sm:$0xff]   ;;  %v908_v8 = vld [vmem:[%s1085_s2 + $0x10] sm:$0xff]  }
   0x4   :  { %826 = vmatprep.subr.bf16.mxu0 %v897_v1  ;;  %876 = vmatprep.subr.bf16.mxu1 %v906_v5  ;;  %v902_v9 = vld [vmem:[%s1083_s0 + $0x20] sm:$0xff]  }
   0x5   :  { %884 = vmatpush3.bf16.msra.mxu1 %v906_v5 }
   0x6   :  { %877 = vmatprep.subr.bf16.mxu1 %v907_v6 }
   0x7   :  { %827 = vmatpush3.bf16.msra.mxu0 %v897_v1 }
   0x8   :  { %844 = vmatprep.subr.bf16.mxu0 %v906_v5 }
   0x9   :  { %885 = vmatpush3.bf16.msra.mxu1 %v907_v6 }
   0xa   :  { %829 = vmatmul.mubr.msk.bf16.vlgmr.msra.gmra.mrb[0].mxu0 %vm91_vm0, %v899_v3 }
   0xb   :  { %832 = vmatprep.mubr.msk.bf16.mxu0 %vm91_vm0, %v900_v4  ;;  %845 = vmatpush3.bf16.msra.mxu0 %v906_v5 }
   0xc   :  { %846 = vmatprep.subr.bf16.mxu0 %v907_v6 }
   0xf   :  { %847 = vmatpush3.bf16.msra.mxu0 %v907_v6 }
  0x10   :  { %11 = vsyncpa [#allocation5], 0  ;;  %848 = vmatprep.subr.bf16.mxu0 %v908_v8  ;;  %v909_v10 = vld [vmem:[%s1085_s2 + $0x18] sm:$0xff]   ;;  %878 = vmatprep.subr.bf16.mxu1 %v908_v8  ;;  %v903_v11 = vld [vmem:[%s1083_s0 + $0x28] sm:$0xff]  }
  0x11   :  { %886 = vmatpush3.bf16.msra.mxu1 %v908_v8  ;;  %v910_v12 = vld [vmem:[%s1085_s2 + $0x20] sm:$0xff]   ;;  %v904_v13 = vld [vmem:[%s1083_s0 + $0x30] sm:$0xff]   ;;  %v911_v14 = vld [vmem:[%s1085_s2 + $0x28] sm:$0xff]  }
  0x12   :  { %833 = vmatmul.mubr.msk.bf16.gmra.mrb[4].mxu0 %vm91_vm0, %v901_v7  ;;  %879 = vmatprep.subr.bf16.mxu1 %v909_v10  ;;  %v905_v15 = vld [vmem:[%s1083_s0 + $0x38] sm:$0xff]   ;;  %v912_v16 = vld [vmem:[%s1085_s2 + $0x30] sm:$0xff]   ;;  %s962_s0 = smov [#allocation2]  }
  0x13   :  { %836 = vmatprep.mubr.msk.bf16.mxu0 %vm91_vm0, %v902_v9  ;;  %849 = vmatpush3.bf16.msra.mxu0 %v908_v8  ;;  %v913_v17 = vld [vmem:[%s1085_s2 + $0x38] sm:$0xff]   ;;  %s587_s2 = sshll.u32 %s962_s0, 4  ;;  %s588_s2 = int_to_ptr.vmem [resolvable:$true] %s587_s2 }
  0x14   :  { %850 = vmatprep.subr.bf16.mxu0 %v909_v10  ;;  %s914_s24 = scalar_lea.vmem %s588_s2, 1024  ;;  %p919_p1 = scmp.lt.s32.totalorder %s588_s2, %s588_s2 }
  0x15   :  { %887 = vmatpush3.bf16.msra.mxu1 %v909_v10  ;;  %p915_p0 = scmp.ne.s32.totalorder %s588_s2, %s914_s24  ;;  %p920_p2 = scmp.lt.s32.totalorder %s914_s24, %s914_s24 }
  0x16   :  { %880 = vmatprep.subr.bf16.mxu1 %v910_v12 }
  0x17   :  { %851 = vmatpush3.bf16.msra.mxu0 %v909_v10  ;;  %p921_p3 = por %p920_p2, %p919_p1 }
  0x18   :  { %852 = vmatprep.subr.bf16.mxu0 %v910_v12 }
  0x19   :  { %888 = vmatpush3.bf16.msra.mxu1 %v910_v12  ;;  %p922_p4 = pnand %p921_p3, %p915_p0 }
  0x1a   :  { %837 = vmatmul.mubr.msk.bf16.gmra.mrb[8].mxu0 %vm91_vm0, %v903_v11  ;;  %881 = vmatprep.subr.bf16.mxu1 %v911_v14 }
  0x1b   :  { %840 = vmatprep.mubr.msk.bf16.mxu0 %vm91_vm0, %v904_v13  ;;  %853 = vmatpush3.bf16.msra.mxu0 %v910_v12 }
  0x1c   :  { %854 = vmatprep.subr.bf16.mxu0 %v911_v14 }
  0x1d   :  { %889 = vmatpush3.bf16.msra.mxu1 %v911_v14 }
  0x1e   :  { %882 = vmatprep.subr.bf16.mxu1 %v912_v16 }
  0x1f   :  { %855 = vmatpush3.bf16.msra.mxu0 %v911_v14 }
  0x20   :  { %856 = vmatprep.subr.bf16.mxu0 %v912_v16 }
  0x21   :  { %890 = vmatpush3.bf16.msra.mxu1 %v912_v16 }
  0x22   :  { %841 = vmatmul.mubr.msk.bf16.gmra.mrb[12].mxu0 %vm91_vm0, %v905_v15  ;;  %883 = vmatprep.subr.bf16.mxu1 %v913_v17 }
  0x23   :  { %857 = vmatpush3.bf16.msra.mxu0 %v912_v16 }
  0x24   :  { %858 = vmatprep.subr.bf16.mxu0 %v913_v17 }
  0x25   :  { %891 = vmatpush3.bf16.msra.mxu1 %v913_v17 }
  0x27   :  { %859 = vmatpush3.bf16.msra.mxu0 %v913_v17 }
  0xdd   :  { %v830_v18 = vpop.f32.mrb[0].mxu0 }
  0xde   :  { %v150_v19 = vpop.f32.mrb[1].mxu0 }
  0xdf   :  { %v831_v20 = vpop.f32.mrb[2].mxu0 }
  0xe0   :  { %v214_v21 = vpack.c.bf16 %v831_v20, %v830_v18  ;;  %v153_v22 = vpop.f32.mrb[3].mxu0 }
  0xe1   :  { %v213_v23 = vpack.c.bf16 %v153_v22, %v150_v19 }
  0xe2   :  { %784 = vst [vmem:[#allocation2 + $0x8] sm:$0xff] %v214_v21  }
  0xe3   :  { %708 = vst [vmem:[#allocation2] sm:$0xff] %v213_v23   ;;  %860 = vmatprep.mubr.bf16.mxu0 %v213_v23 }
  0xe4   :  { %861 = vmatmul.mubr.bf16.vlgmr.msra.gmra.mrb[16].mxu0 %v214_v21 }
  0xe5   :  { %v834_v24 = vpop.f32.mrb[4].mxu0 }
  0xe6   :  { %v166_v25 = vpop.f32.mrb[5].mxu0 }
  0xe7   :  { %v835_v26 = vpop.f32.mrb[6].mxu0 }
  0xe8   :  { %v216_v27 = vpack.c.bf16 %v835_v26, %v834_v24  ;;  %v169_v28 = vpop.f32.mrb[7].mxu0 }
  0xe9   :  { %v215_v29 = vpack.c.bf16 %v169_v28, %v166_v25 }
  0xea   :  { %786 = vst [vmem:[#allocation2 + $0x18] sm:$0xff] %v216_v27  }
  0xeb   :  { %785 = vst [vmem:[#allocation2 + $0x10] sm:$0xff] %v215_v29   ;;  %864 = vmatprep.mubr.bf16.mxu1 %v215_v29 }
  0xec   :  { %865 = vmatmul.mubr.bf16.vlgmr.msra.gmra.mrb[0].mxu1 %v216_v27 }
  0xed   :  { %v838_v30 = vpop.f32.mrb[8].mxu0 }
  0xee   :  { %v182_v31 = vpop.f32.mrb[9].mxu0 }
  0xef   :  { %v839_v32 = vpop.f32.mrb[10].mxu0 }
  0xf0   :  { %v218_v33 = vpack.c.bf16 %v839_v32, %v838_v30  ;;  %v185_v34 = vpop.f32.mrb[11].mxu0 }
  0xf1   :  { %v217_v35 = vpack.c.bf16 %v185_v34, %v182_v31 }
  0xf2   :  { %788 = vst [vmem:[#allocation2 + $0x28] sm:$0xff] %v218_v33  }
  0xf3   :  { %787 = vst [vmem:[#allocation2 + $0x20] sm:$0xff] %v217_v35   ;;  %868 = vmatprep.mubr.bf16.mxu1 %v217_v35 }
  0xf4   :  { %869 = vmatmul.mubr.bf16.gmra.mrb[4].mxu1 %v218_v33 }
  0xf5   :  { %v842_v36 = vpop.f32.mrb[12].mxu0 }
  0xf6   :  { %v198_v37 = vpop.f32.mrb[13].mxu0 }
  0xf7   :  { %v843_v38 = vpop.f32.mrb[14].mxu0 }
  0xf8   :  { %v220_v39 = vpack.c.bf16 %v843_v38, %v842_v36  ;;  %v201_v40 = vpop.f32.mrb[15].mxu0 }
  0xf9   :  { %v219_v41 = vpack.c.bf16 %v201_v40, %v198_v37 }
  0xfa   :  { %790 = vst [vmem:[#allocation2 + $0x38] sm:$0xff] %v220_v39  }
  0xfb   :  { %789 = vst [vmem:[#allocation2 + $0x30] sm:$0xff] %v219_v41   ;;  %872 = vmatprep.mubr.bf16.mxu1 %v219_v41 }
  0xfc   :  { %873 = vmatmul.mubr.bf16.gmra.mrb[8].mxu1 %v220_v39 }
  0xfd   :  { %925 = shalt.err (!%p922_p4)
}
  0xfe   :  { %s926_s26 = scalar_lea.hbm %s1086_s3, 1024 }
  0xff   :  { %p927_p5 = scmp.ne.s32.totalorder %s1086_s3, %s926_s26  ;;  %p930_p6 = scmp.lt.u32.totalorder %s926_s26, %s1086_s3 }
 0x101   :  { %p932_p7 = pnand %p930_p6, %p927_p5 }
 0x103   :  { %935 = shalt.err (!%p932_p7)
}
 0x104   :  { %s963_s5 = smov 64   ;;  %s964_s6 = smov 4  }
 0x105   :  { %593 = dma.vmem_to_hbm [thread:$0]  %s588_s2, 1024, %s1086_s3, [#allocation3], %s963_s5, %s963_s5, %s964_s6  }
 0x106   :  { %s965_s3 = smov [#allocation4]  }
 0x107   :  { %s599_s9 = sshll.u32 %s965_s3, 4  ;;  %s600_s9 = int_to_ptr.vmem [resolvable:$true] %s599_s9 }
 0x108   :  { %s936_s10 = scalar_lea.vmem %s600_s9, 1024  ;;  %p941_p9 = scmp.lt.s32.totalorder %s600_s9, %s600_s9 }
 0x109   :  { %p937_p8 = scmp.ne.s32.totalorder %s600_s9, %s936_s10  ;;  %p942_p10 = scmp.lt.s32.totalorder %s936_s10, %s936_s10 }
 0x10b   :  { %p943_p11 = por %p942_p10, %p941_p9 }
 0x10d   :  { %p944_p12 = pnand %p943_p11, %p937_p8 }
 0x1b7   :  { %v862_v42 = vpop.f32.mrb[16].mxu0 }
 0x1b8   :  { %v400_v43 = vmul.f32 0.01, %v862_v42  ;;  %v319_v44 = vpop.f32.mrb[17].mxu0  ;;  %vm384_vm1 = vcmp.ge.f32.partialorder %v862_v42, 0.0 }
 0x1b9   :  { %v398_v45 = vmul.f32 0.01, %v319_v44  ;;  %v863_v46 = vpop.f32.mrb[18].mxu0  ;;  %vm382_vm2 = vcmp.ge.f32.partialorder %v319_v44, 0.0 }
 0x1ba   :  { %vm385_vm3 = vcmp.ge.f32.partialorder %v863_v46, 0.0  ;;  %v401_v47 = vmul.f32 0.01, %v863_v46  ;;  %v322_v48 = vpop.f32.mrb[19].mxu0  ;;  %v416_v50 = vsel %vm384_vm1, %v862_v42, %v400_v43 }
 0x1bb   :  { %vm383_vm4 = vcmp.ge.f32.partialorder %v322_v48, 0.0  ;;  %v399_v49 = vmul.f32 0.01, %v322_v48  ;;  %v414_v52 = vsel %vm382_vm2, %v319_v44, %v398_v45 }
 0x1bc   :  { %v417_v51 = vsel %vm385_vm3, %v863_v46, %v401_v47 }
 0x1bd   :  { %v752_v53 = vpack.c.bf16 %v417_v51, %v416_v50  ;;  %v415_v54 = vsel %vm383_vm4, %v322_v48, %v399_v49 }
 0x1be   :  { %v747_v55 = vpack.c.bf16 %v415_v54, %v414_v52 }
 0x1bf   :  { %791 = vst [vmem:[#allocation4 + $0x8] sm:$0xff] %v752_v53   ;;  %v866_v56 = vpop.f32.mrb[0].mxu1 }
 0x1c0   :  { %748 = vst [vmem:[#allocation4] sm:$0xff] %v747_v55   ;;  %v404_v57 = vmul.f32 0.01, %v866_v56  ;;  %v335_v58 = vpop.f32.mrb[1].mxu1  ;;  %vm388_vm5 = vcmp.ge.f32.partialorder %v866_v56, 0.0 }
 0x1c1   :  { %v402_v59 = vmul.f32 0.01, %v335_v58  ;;  %v867_v60 = vpop.f32.mrb[2].mxu1  ;;  %vm386_vm6 = vcmp.ge.f32.partialorder %v335_v58, 0.0 }
 0x1c2   :  { %vm389_vm7 = vcmp.ge.f32.partialorder %v867_v60, 0.0  ;;  %v405_v61 = vmul.f32 0.01, %v867_v60  ;;  %v338_v62 = vpop.f32.mrb[3].mxu1  ;;  %v420_v0 = vsel %vm388_vm5, %v866_v56, %v404_v57 }
 0x1c3   :  { %vm387_vm8 = vcmp.ge.f32.partialorder %v338_v62, 0.0  ;;  %v403_v63 = vmul.f32 0.01, %v338_v62  ;;  %v418_v2 = vsel %vm386_vm6, %v335_v58, %v402_v59 }
 0x1c4   :  { %v421_v1 = vsel %vm389_vm7, %v867_v60, %v405_v61 }
 0x1c5   :  { %v762_v3 = vpack.c.bf16 %v421_v1, %v420_v0  ;;  %v419_v4 = vsel %vm387_vm8, %v338_v62, %v403_v63 }
 0x1c6   :  { %v757_v5 = vpack.c.bf16 %v419_v4, %v418_v2 }
 0x1c7   :  { %793 = vst [vmem:[#allocation4 + $0x18] sm:$0xff] %v762_v3   ;;  %v870_v6 = vpop.f32.mrb[4].mxu1 }
 0x1c8   :  { %792 = vst [vmem:[#allocation4 + $0x10] sm:$0xff] %v757_v5   ;;  %v408_v7 = vmul.f32 0.01, %v870_v6  ;;  %v351_v8 = vpop.f32.mrb[5].mxu1  ;;  %vm392_vm9 = vcmp.ge.f32.partialorder %v870_v6, 0.0 }
 0x1c9   :  { %v406_v9 = vmul.f32 0.01, %v351_v8  ;;  %v871_v10 = vpop.f32.mrb[6].mxu1  ;;  %vm390_vm10 = vcmp.ge.f32.partialorder %v351_v8, 0.0 }
 0x1ca   :  { %vm393_vm11 = vcmp.ge.f32.partialorder %v871_v10, 0.0  ;;  %v409_v11 = vmul.f32 0.01, %v871_v10  ;;  %v354_v12 = vpop.f32.mrb[7].mxu1  ;;  %v424_v14 = vsel %vm392_vm9, %v870_v6, %v408_v7 }
 0x1cb   :  { %vm391_vm12 = vcmp.ge.f32.partialorder %v354_v12, 0.0  ;;  %v407_v13 = vmul.f32 0.01, %v354_v12  ;;  %v422_v16 = vsel %vm390_vm10, %v351_v8, %v406_v9 }
 0x1cc   :  { %v425_v15 = vsel %vm393_vm11, %v871_v10, %v409_v11 }
 0x1cd   :  { %v772_v17 = vpack.c.bf16 %v425_v15, %v424_v14  ;;  %v423_v18 = vsel %vm391_vm12, %v354_v12, %v407_v13 }
 0x1ce   :  { %v767_v19 = vpack.c.bf16 %v423_v18, %v422_v16 }
 0x1cf   :  { %795 = vst [vmem:[#allocation4 + $0x28] sm:$0xff] %v772_v17   ;;  %v874_v20 = vpop.f32.mrb[8].mxu1 }
 0x1d0   :  { %794 = vst [vmem:[#allocation4 + $0x20] sm:$0xff] %v767_v19   ;;  %v412_v21 = vmul.f32 0.01, %v874_v20  ;;  %v367_v22 = vpop.f32.mrb[9].mxu1  ;;  %vm396_vm13 = vcmp.ge.f32.partialorder %v874_v20, 0.0 }
 0x1d1   :  { %v410_v23 = vmul.f32 0.01, %v367_v22  ;;  %v875_v24 = vpop.f32.mrb[10].mxu1  ;;  %vm394_vm14 = vcmp.ge.f32.partialorder %v367_v22, 0.0 }
 0x1d2   :  { %vm397_vm15 = vcmp.ge.f32.partialorder %v875_v24, 0.0  ;;  %v413_v25 = vmul.f32 0.01, %v875_v24  ;;  %v370_v26 = vpop.f32.mrb[11].mxu1  ;;  %v428_v28 = vsel %vm396_vm13, %v874_v20, %v412_v21 }
 0x1d3   :  { %vm395_vm0 = vcmp.ge.f32.partialorder %v370_v26, 0.0  ;;  %v411_v27 = vmul.f32 0.01, %v370_v26  ;;  %v426_v30 = vsel %vm394_vm14, %v367_v22, %v410_v23 }
 0x1d4   :  { %v429_v29 = vsel %vm397_vm15, %v875_v24, %v413_v25 }
 0x1d5   :  { %v782_v31 = vpack.c.bf16 %v429_v29, %v428_v28  ;;  %v427_v32 = vsel %vm395_vm0, %v370_v26, %v411_v27 }
 0x1d6   :  { %v777_v33 = vpack.c.bf16 %v427_v32, %v426_v30 }
 0x1d7   :  { %797 = vst [vmem:[#allocation4 + $0x38] sm:$0xff] %v782_v31  }
 0x1d8   :  { %796 = vst [vmem:[#allocation4 + $0x30] sm:$0xff] %v777_v33  }
 0x1d9   :  { %947 = shalt.err (!%p944_p12)
}
 0x1da   :  { %s948_s13 = scalar_lea.hbm %s1087_s4, 1024 }
 0x1db   :  { %p949_p13 = scmp.ne.s32.totalorder %s1087_s4, %s948_s13  ;;  %p952_p0 = scmp.lt.u32.totalorder %s948_s13, %s1087_s4 }
 0x1dd   :  { %p954_p1 = pnand %p952_p0, %p949_p13 }
 0x1df   :  { %957 = shalt.err (!%p954_p1)
}
 0x1e0   :  { %605 = dma.vmem_to_hbm [thread:$0]  %s600_s9, 1024, %s1087_s4, [#allocation5], %s963_s5, %s963_s5, %s964_s6  }
 0x1e1   :  { %958 = dma.done.wait [#allocation3], 1024  }
 0x1e2   :  { %959 = vsyncadd [#allocation3], 4294966272 }
 0x1e3   :  { %960 = dma.done.wait [#allocation5], 1024  }
 0x1e4   :  { %961 = vsyncadd [#allocation5], 4294966272 }
 0x1e5   :  { %612 = vsyncpa [#allocation3], 1 }
 0x1e6   :  { %613 = vsyncpa [#allocation5], 1 }

</bundles_post_ra>
